<compile_context>
chip_gen: v5e
topology: v5e:2x2
jax: 0.10.0
libtpu: 0.0.40
codegen_flags: <defaults>
</compile_context>

<pallas_src>
import functools

import jax
import jax.numpy as jnp
from jax import lax
from jax.experimental import pallas as pl
from jax.experimental.pallas import tpu as pltpu


# ----------------------------------------------------------------------------
# Hardware / budget helpers
# ----------------------------------------------------------------------------

_VMEM_BUDGET_FRACTION = 0.60     # fraction of physical VMEM used for input blocks + temps
_F32_TEMPS_BUDGET = 6            # f32 full-tile temporaries assumed live (tile chooser)
_F32_TEMPS_LIMIT = 7             # f32 full-tile temporaries assumed live (vmem_limit, ragged)
_MAX_TILE_B = 8192               # row cap for the row-major batch tile
_MAX_TILE_N = 1 << 16            # lane cap for the class-major batch tile


def _vmem_capacity_bytes():
    """Physical per-core VMEM capacity; conservative 64 MiB (v7x) fallback."""
    try:
        cap = int(pltpu.get_tpu_info().vmem_capacity_bytes)
        if cap > 0:
            return cap
    except Exception:
        pass
    return 64 << 20


def _sublane_rows(min_itemsize):
    """Sublane packing of the narrowest input dtype: f32->8, bf16->16, int8->32."""
    return 8 * max(1, 4 // max(1, min(4, min_itemsize)))


# ----------------------------------------------------------------------------
# Row-major kernels (C >= 128):  grid = (batch_blocks[, class_blocks])
# ----------------------------------------------------------------------------

def _rm_single_kernel(*refs, inv_t, n_rows, tile_b, mask_rows):
    """Whole class axis in one block (nc == 1): direct logsumexp, no carries."""
    if inv_t is None:
        inv_t_ref, out_ref, tgt_ref, part_ref = refs
        inv_t = inv_t_ref[0]
    else:
        out_ref, tgt_ref, part_ref = refs
        inv_t = jnp.float32(inv_t)

    logits = out_ref[...].astype(jnp.float32) * inv_t
    tgt = tgt_ref[...].astype(jnp.float32)

    m = jnp.max(logits, axis=1, keepdims=True)
    lse = m + jnp.log(jnp.sum(jnp.exp(logits - m), axis=1, keepdims=True))
    #  -sum_j tgt_ij * log_prob_ij  ==  lse_i * sum_j tgt_ij - sum_j tgt_ij * z_ij
    row_loss = (lse * jnp.sum(tgt, axis=1, keepdims=True)
                - jnp.sum(logits * tgt, axis=1, keepdims=True))

    if mask_rows:
        bi = pl.program_id(0)
        row = bi * tile_b + lax.broadcasted_iota(jnp.int32, (tile_b, 1), 0)
        row_loss = jnp.where(row < n_rows, row_loss, 0.0)

    part_ref[...] = row_loss


def _rm_multi_kernel(*refs, inv_t, n_rows, n_cols, tile_b, tile_c,
                     mask_rows, mask_cols):
    """Class axis tiled (nc > 1): online logsumexp + running reductions."""
    if inv_t is None:
        (inv_t_ref, out_ref, tgt_ref, part_ref,
         m_ref, l_ref, ts_ref, dot_ref) = refs
        inv_t = inv_t_ref[0]
    else:
        (out_ref, tgt_ref, part_ref,
         m_ref, l_ref, ts_ref, dot_ref) = refs
        inv_t = jnp.float32(inv_t)

    bi = pl.program_id(0)
    ci = pl.program_id(1)
    nc = pl.num_programs(1)

    @pl.when(ci == 0)
    def _init_carries():
        m_ref[...] = jnp.full_like(m_ref, -jnp.inf)
        l_ref[...] = jnp.zeros_like(l_ref)
        ts_ref[...] = jnp.zeros_like(ts_ref)
        dot_ref[...] = jnp.zeros_like(dot_ref)

    logits = out_ref[...].astype(jnp.float32) * inv_t
    tgt = tgt_ref[...].astype(jnp.float32)

    def update(z, t, prod):
        m_prev = m_ref[...]
        m_new = jnp.maximum(m_prev, jnp.max(z, axis=1, keepdims=True))
        p_sum = jnp.sum(jnp.exp(z - m_new), axis=1, keepdims=True)
        l_ref[...] = l_ref[...] * jnp.exp(m_prev - m_new) + p_sum
        m_ref[...] = m_new
        ts_ref[...] = ts_ref[...] + jnp.sum(t, axis=1, keepdims=True)
        dot_ref[...] = dot_ref[...] + jnp.sum(prod, axis=1, keepdims=True)

    if mask_cols:
        # Only the final class tile is ragged: interior tiles take the unmasked
        # fast path; the last tile pays for the iota + selects.
        @pl.when(ci < nc - 1)
        def _interior():
            update(logits, tgt, logits * tgt)

        @pl.when(ci == nc - 1)
        def _ragged():
            col = ci * tile_c + lax.broadcasted_iota(
                jnp.int32, (tile_b, tile_c), 1)
            cmask = col < n_cols
            update(jnp.where(cmask, logits, -jnp.inf),
                   jnp.where(cmask, tgt, 0.0),
                   jnp.where(cmask, logits * tgt, 0.0))
    else:
        update(logits, tgt, logits * tgt)

    @pl.when(ci == nc - 1)
    def _finalize():
        lse = m_ref[...] + jnp.log(l_ref[...])
        row_loss = lse * ts_ref[...] - dot_ref[...]
        if mask_rows:
            row = bi * tile_b + lax.broadcasted_iota(jnp.int32, (tile_b, 1), 0)
            row_loss = jnp.where(row < n_rows, row_loss, 0.0)
        part_ref[...] = row_loss


def _soft_ce_row_major(output, soft_target, inv_t, mean, vmem_cap,
                       tile_b=None, tile_c=None):
    N, C = output.shape
    isz_o = jnp.dtype(output.dtype).itemsize
    isz_t = jnp.dtype(soft_target.dtype).itemsize
    isz = isz_o + isz_t
    sub = _sublane_rows(min(isz_o, isz_t))

    budget = int(_VMEM_BUDGET_FRACTION * vmem_cap)
    per_elem = 2 * isz + _F32_TEMPS_BUDGET * 4     # double-buffered inputs + f32 temps
    max_elems = max(budget // per_elem, 8 * 128)

    if tile_c is None:
        # Prefer the full class axis when it fits at >= `sub` rows (nc == 1 path).
        tc = C if C <= max_elems // sub else max(128, (max_elems // sub) // 128 * 128)
        tc = min(tc, C)
    else:
        tc = tile_c
    if tile_b is None:
        tb = (max_elems // max(tc, 1)) // sub * sub
        tb = max(sub, min(tb, _MAX_TILE_B))
        if tb >= N:
            tb = N
    else:
        tb = tile_b

    assert tb == N or tb % 8 == 0, "tile_b must be a multiple of 8 or the full batch"
    assert tc == C or tc % 128 == 0, "tile_c must be a multiple of 128 or the full class dim"

    nb = pl.cdiv(N, tb)
    nc = pl.cdiv(C, tc)
    mask_rows = (N % tb) != 0
    mask_cols = (C % tc) != 0

    static_inv_t = inv_t if isinstance(inv_t, float) else None
    operands, in_specs = [], []
    if static_inv_t is None:
        operands.append(inv_t)                                   # (1,) f32, traced temp
        in_specs.append(pl.BlockSpec(memory_space=pltpu.SMEM))
    operands += [output, soft_target]

    # Tight VMEM accounting: 2x double-buffered input blocks, worst-case live f32/i32
    # temporaries on the ragged tile, lane-padded (tb, 1) carries + output block.
    blk = tb * tc
    vmem_limit = int(2 * blk * isz
                     + _F32_TEMPS_LIMIT * blk * 4
                     + 6 * tb * 128 * 4
                     + (2 << 20))
    vmem_limit = min(max(vmem_limit, 8 << 20), int(0.9 * vmem_cap))

    out_shape = jax.ShapeDtypeStruct((nb * tb, 1), jnp.float32)

    if nc == 1:
        kernel = functools.partial(_rm_single_kernel, inv_t=static_inv_t,
                                   n_rows=N, tile_b=tb, mask_rows=mask_rows)
        in_specs += [pl.BlockSpec((tb, tc), lambda i: (i, 0)),
                     pl.BlockSpec((tb, tc), lambda i: (i, 0))]
        grid = (nb,)
        out_spec = pl.BlockSpec((tb, 1), lambda i: (i, 0))
        scratch = []
        dims = ("parallel",)
    else:
        kernel = functools.partial(_rm_multi_kernel, inv_t=static_inv_t,
                                   n_rows=N, n_cols=C, tile_b=tb, tile_c=tc,
                                   mask_rows=mask_rows, mask_cols=mask_cols)
        in_specs += [pl.BlockSpec((tb, tc), lambda i, k: (i, k)),
                     pl.BlockSpec((tb, tc), lambda i, k: (i, k))]
        grid = (nb, nc)
        out_spec = pl.BlockSpec((tb, 1), lambda i, k: (i, 0))
        scratch = [pltpu.VMEM((tb, 1), jnp.float32)] * 4         # m, l, sum(tgt), dot
        dims = ("parallel", "arbitrary")                          # class (reduction) axis last

    partials = pl.pallas_call(
        kernel,
        out_shape=out_shape,
        grid=grid,
        in_specs=in_specs,
        out_specs=out_spec,
        scratch_shapes=scratch,
        compiler_params=pltpu.CompilerParams(
            dimension_semantics=dims,
            vmem_limit_bytes=vmem_limit),
    )(*operands)

    loss = jnp.sum(partials)            # nb*tb partial rows -> one tiny XLA reduce
    if mean:
        loss = loss / jnp.float32(N)
    return loss


# ----------------------------------------------------------------------------
# Class-major kernel (C < 128):  inputs transposed to (C, N), grid over N blocks
# ----------------------------------------------------------------------------

def _cm_kernel(*refs, inv_t, n_rows, tile_n, mask_cols):
    if inv_t is None:
        inv_t_ref, out_ref, tgt_ref, part_ref = refs
        inv_t = inv_t_ref[0]
    else:
        out_ref, tgt_ref, part_ref = refs
        inv_t = jnp.float32(inv_t)

    logits = out_ref[...].astype(jnp.float32) * inv_t            # (C, tn)
    tgt = tgt_ref[...].astype(jnp.float32)

    m = jnp.max(logits, axis=0, keepdims=True)                   # (1, tn), lane dense
    lse = m + jnp.log(jnp.sum(jnp.exp(logits - m), axis=0, keepdims=True))
    loss = (lse * jnp.sum(tgt, axis=0, keepdims=True)
            - jnp.sum(logits * tgt, axis=0, keepdims=True))      # per-sample loss, (1, tn)

    if mask_cols:
        i = pl.program_id(0)
        col = i * tile_n + lax.broadcasted_iota(jnp.int32, (1, tile_n), 1)
        loss = jnp.where(col < n_rows, loss, 0.0)

    # Write an (8, tn)-aligned, lane-dense slab: real losses on row 0, zeros below.
    row0 = lax.broadcasted_iota(jnp.int32, (8, tile_n), 0) == 0
    part_ref[...] = jnp.where(row0, jnp.broadcast_to(loss, (8, tile_n)), 0.0)


def _soft_ce_class_major(output, soft_target, inv_t, mean, vmem_cap, tile_n=None):
    N, C = output.shape
    # One small extra HBM pass (C < 128 regime, so the whole problem is tiny);
    # buys ~128/C x lane density inside the kernel.
    out_t = jnp.transpose(output)            # (C, N)
    tgt_t = jnp.transpose(soft_target)       # (C, N)

    isz = jnp.dtype(output.dtype).itemsize + jnp.dtype(soft_target.dtype).itemsize
    budget = int(_VMEM_BUDGET_FRACTION * vmem_cap)
    per_elem = 2 * isz + _F32_TEMPS_BUDGET * 4

    if tile_n is None:
        tn = (budget // (per_elem * max(C, 1))) // 128 * 128
        tn = max(128, min(tn, _MAX_TILE_N))
        if tn >= N:
            tn = N
    else:
        tn = tile_n
    assert tn == N or tn % 128 == 0, "tile_n must be a multiple of 128 or the full batch"

    nblk = pl.cdiv(N, tn)
    mask_cols = (N % tn) != 0

    static_inv_t = inv_t if isinstance(inv_t, float) else None
    operands, in_specs = [], []
    if static_inv_t is None:
        operands.append(inv_t)
        in_specs.append(pl.BlockSpec(memory_space=pltpu.SMEM))
    operands += [out_t, tgt_t]
    in_specs += [pl.BlockSpec((C, tn), lambda i: (0, i)),
                 pl.BlockSpec((C, tn), lambda i: (0, i))]

    kernel = functools.partial(_cm_kernel, inv_t=static_inv_t, n_rows=N,
                               tile_n=tn, mask_cols=mask_cols)

    blk = C * tn
    vmem_limit = int(2 * blk * isz
                     + _F32_TEMPS_LIMIT * blk * 4
                     + 2 * 8 * tn * 4
                     + (2 << 20))
    vmem_limit = min(max(vmem_limit, 8 << 20), int(0.9 * vmem_cap))

    partials = pl.pallas_call(
        kernel,
        out_shape=jax.ShapeDtypeStruct((8, nblk * tn), jnp.float32),
        grid=(nblk,),
        in_specs=in_specs,
        out_specs=pl.BlockSpec((8, tn), lambda i: (0, i)),
        compiler_params=pltpu.CompilerParams(
            dimension_semantics=("parallel",),
            vmem_limit_bytes=vmem_limit),
    )(*operands)

    loss = jnp.sum(partials)
    if mean:
        loss = loss / jnp.float32(N)
    return loss


# ----------------------------------------------------------------------------
# Public wrapper (matches the PyTorch module's forward)
# ----------------------------------------------------------------------------

def soft_target_cross_entropy(output, soft_target, kd_temp, mean=True,
                              tile_b=None, tile_c=None, tile_n=None):
    """output, soft_target: (N, C). kd_temp: scalar (Python number or array).

    Returns the f32 scalar loss:
        -sum(log_softmax(output/kd_temp, axis=1) * soft_target) [/ N if mean].
    """
    N, C = output.shape
    assert soft_target.shape == (N, C)

    if isinstance(kd_temp, (int, float)):
        inv_t = float(1.0 / float(kd_temp))       # static: baked into the kernel
    else:
        inv_t = (jnp.float32(1.0) /
                 jnp.asarray(kd_temp, jnp.float32)).reshape(1)   # traced: SMEM scalar

    vmem_cap = _vmem_capacity_bytes()

    # Small-C regime (C < 128): the row-major layout would leave ~C/128 of each
    # vreg useful; use the class-major kernel instead (unless tiles are forced).
    if C < 128 and tile_b is None and tile_c is None:
        return _soft_ce_class_major(output, soft_target, inv_t, mean, vmem_cap,
                                    tile_n=tile_n)
    return _soft_ce_row_major(output, soft_target, inv_t, mean, vmem_cap,
                              tile_b=tile_b, tile_c=tile_c)


# ----------------------------------------------------------------------------
# Reference + tests
# ----------------------------------------------------------------------------

def _reference(output, soft_target, kd_temp, mean=True):
    log_prob = jax.nn.log_softmax(output.astype(jnp.float32) / kd_temp, axis=1)
    loss = -jnp.sum(log_prob * soft_target.astype(jnp.float32))
    if mean:
        loss = loss / output.shape[0]
    return loss


if __name__ == "__main__":
    key = jax.random.PRNGKey(0)
    keys = jax.random.split(key, 8)
    kd_temp = 2.0

    def check(got, want):
        got = jax.block_until_ready(got)
        assert jnp.allclose(got, want, rtol=1e-5, atol=1e-4), (got, want)

    # 1) Small-C (class-major path), single block; mean and sum; static kd_temp.
    N1, C1 = 16, 32
    out1 = jax.random.normal(keys[0], (N1, C1), dtype=jnp.float32)
    tgt1 = jax.nn.softmax(
        jax.random.normal(keys[1], (N1, C1), dtype=jnp.float32) / kd_temp, axis=1)
    check(soft_target_cross_entropy(out1, tgt1, kd_temp, mean=True),
          _reference(out1, tgt1, kd_temp, mean=True))
    check(soft_target_cross_entropy(out1, tgt1, kd_temp, mean=False),
          _reference(out1, tgt1, kd_temp, mean=False))

    # 1b) Traced temperature -> SMEM scalar path.
    check(soft_target_cross_entropy(out1, tgt1,
                                    jnp.asarray(kd_temp, dtype=jnp.float32), mean=True),
          _reference(out1, tgt1, kd_temp, mean=True))

    # 2) Row-major multi-class-tile path with ragged rows AND columns (carries,
    #    last-tile-only column masking), static and traced temperature.
    N2, C2 = 20, 160
    out2 = jax.random.normal(keys[2], (N2, C2), dtype=jnp.float32)
    tgt2 = jax.nn.softmax(
        jax.random.normal(keys[3], (N2, C2), dtype=jnp.float32) / kd_temp, axis=1)
    ref2 = _reference(out2, tgt2, kd_temp, mean=True)
    check(soft_target_cross_entropy(out2, tgt2, kd_temp, mean=True,
                                    tile_b=8, tile_c=128), ref2)
    check(soft_target_cross_entropy(out2, tgt2, jnp.asarray(kd_temp, jnp.float32),
                                    mean=True, tile_b=8, tile_c=128), ref2)

    # 3) Row-major nc == 1 specialization (no carries) with ragged rows.
    N3, C3 = 24, 256
    out3 = jax.random.normal(keys[4], (N3, C3), dtype=jnp.float32)
    tgt3 = jax.nn.softmax(
        jax.random.normal(keys[5], (N3, C3), dtype=jnp.float32) / kd_temp, axis=1)
    check(soft_target_cross_entropy(out3, tgt3, kd_temp, mean=True, tile_b=16),
          _reference(out3, tgt3, kd_temp, mean=True))

    # 4) Class-major path with ragged batch blocks (typical small-C KD shape).
    N4, C4 = 200, 10
    out4 = jax.random.normal(keys[6], (N4, C4), dtype=jnp.float32)
    tgt4 = jax.nn.softmax(
        jax.random.normal(keys[7], (N4, C4), dtype=jnp.float32) / kd_temp, axis=1)
    check(soft_target_cross_entropy(out4, tgt4, kd_temp, mean=True, tile_n=128),
          _reference(out4, tgt4, kd_temp, mean=True))

    print("KERNEL_OK")
</pallas_src>

<mosaic_0001>
module attributes {stable_mosaic.version = 11 : i64} {
  func.func @_cm_kernel(%arg0: i32, %arg1: memref<32x16xf32, #tpu.memory_space<vmem>>, %arg2: memref<32x16xf32, #tpu.memory_space<vmem>>, %arg3: memref<8x16xf32, #tpu.memory_space<vmem>>) attributes {dimension_semantics = [#tpu.dimension_semantics<parallel>], iteration_bounds = array<i64: 1>, scalar_prefetch = 0 : i64, scratch_operands = 0 : i64, tpu.core_type = #tpu.core_type<tc>, window_params = [{transform_indices = @transform_0, window_bounds = array<i64: 32, 16>}, {transform_indices = @transform_1, window_bounds = array<i64: 32, 16>}, {transform_indices = @transform_2, window_bounds = array<i64: 8, 16>}]} {
    %c0 = arith.constant 0 : index
    %c0_0 = arith.constant 0 : index
    %0 = vector.load %arg1[%c0, %c0_0] : memref<32x16xf32, #tpu.memory_space<vmem>>, vector<32x16xf32>
    %cst = arith.constant 5.000000e-01 : f32
    %1 = vector.broadcast %cst : f32 to vector<32x16xf32>
    %2 = arith.mulf %0, %1 : vector<32x16xf32>
    %c0_1 = arith.constant 0 : index
    %c0_2 = arith.constant 0 : index
    %3 = vector.load %arg2[%c0_1, %c0_2] : memref<32x16xf32, #tpu.memory_space<vmem>>, vector<32x16xf32>
    %cst_3 = arith.constant dense<0xFF800000> : vector<16xf32>
    %4 = vector.multi_reduction <maximumf>, %2, %cst_3 [0] : vector<32x16xf32> to vector<16xf32>
    %5 = vector.shape_cast %4 : vector<16xf32> to vector<1x16xf32>
    %6 = vector.broadcast %5 : vector<1x16xf32> to vector<32x16xf32>
    %7 = arith.subf %2, %6 : vector<32x16xf32>
    %8 = math.exp %7 : vector<32x16xf32>
    %cst_4 = arith.constant dense<0.000000e+00> : vector<16xf32>
    %9 = vector.multi_reduction <add>, %8, %cst_4 [0] : vector<32x16xf32> to vector<16xf32>
    %10 = vector.shape_cast %9 : vector<16xf32> to vector<1x16xf32>
    %11 = math.log %10 : vector<1x16xf32>
    %12 = arith.addf %5, %11 : vector<1x16xf32>
    %cst_5 = arith.constant dense<0.000000e+00> : vector<16xf32>
    %13 = vector.multi_reduction <add>, %3, %cst_5 [0] : vector<32x16xf32> to vector<16xf32>
    %14 = vector.shape_cast %13 : vector<16xf32> to vector<1x16xf32>
    %15 = arith.mulf %12, %14 : vector<1x16xf32>
    %16 = arith.mulf %2, %3 : vector<32x16xf32>
    %cst_6 = arith.constant dense<0.000000e+00> : vector<16xf32>
    %17 = vector.multi_reduction <add>, %16, %cst_6 [0] : vector<32x16xf32> to vector<16xf32>
    %18 = vector.shape_cast %17 : vector<16xf32> to vector<1x16xf32>
    %19 = arith.subf %15, %18 : vector<1x16xf32>
    %20 = tpu.iota {dimensions = array<i32: 0>} : vector<8x16xi32>
    %c0_i32 = arith.constant 0 : i32
    %21 = vector.broadcast %c0_i32 : i32 to vector<8x16xi32>
    %22 = arith.cmpi eq, %20, %21 : vector<8x16xi32>
    %23 = vector.shape_cast %19 : vector<1x16xf32> to vector<1x16xf32>
    %24 = vector.broadcast %23 : vector<1x16xf32> to vector<8x16xf32>
    %cst_7 = arith.constant 0.000000e+00 : f32
    %25 = vector.broadcast %cst_7 : f32 to vector<8x16xf32>
    %26 = arith.select %22, %24, %25 : vector<8x16xi1>, vector<8x16xf32>
    %c0_8 = arith.constant 0 : index
    %c0_9 = arith.constant 0 : index
    %27 = vector.load %arg3[%c0_8, %c0_9] : memref<8x16xf32, #tpu.memory_space<vmem>>, vector<8x16xf32>
    tpu.vector_store %arg3[%c0_8, %c0_9], %26 {strides = array<i32>} : memref<8x16xf32, #tpu.memory_space<vmem>>, vector<8x16xf32>,
    return
  }
  func.func @transform_0(%arg0: i32) -> (i32, i32) {
    %c0_i32 = arith.constant 0 : i32
    %c0_i32_0 = arith.constant 0 : i32
    return %c0_i32, %arg0 : i32, i32
  }
  func.func @transform_1(%arg0: i32) -> (i32, i32) {
    %c0_i32 = arith.constant 0 : i32
    %c0_i32_0 = arith.constant 0 : i32
    return %c0_i32, %arg0 : i32, i32
  }
  func.func @transform_2(%arg0: i32) -> (i32, i32) {
    %c0_i32 = arith.constant 0 : i32
    %c0_i32_0 = arith.constant 0 : i32
    return %c0_i32, %arg0 : i32, i32
  }
}

</mosaic_0001>

<bundles_post_ra>
// kernel: tpu_custom_call.1
= control target key start
LH: loop header
LB: loop body
LE: loop exit
PB: predicated region body
PF: predicated region fallthrough
CT: control target
= control target key end

     0   :  { %vm24_vm0 = vcmask 130048   ;;  %s223_s0 = inlined_call_operand.vmem [shape: f32[32,16], index: 0, kind: input, shape index: {}]   ;;  %s224_s1 = inlined_call_operand.vmem [shape: f32[32,16], index: 1, kind: input, shape index: {}]   ;;  %s225_s2 = inlined_call_operand.hbm [shape: f32[8,16], index: 2, kind: output, shape index: {}]  }
   0x1   :  { %v12_v0 = vld [vmem:[%s223_s0] sm:$0xff]  ;;  %v13_v1 = vld [vmem:[%s223_s0 + $0x8] sm:$0xff]  ;;  %v14_v2 = vld [vmem:[%s223_s0 + $0x10] sm:$0xff] }
   0x2   :  { %v15_v3 = vld [vmem:[%s223_s0 + $0x18] sm:$0xff]  ;;  %v16_v4 = vmul.f32 0.5, %v12_v0  ;;  %v17_v5 = vmul.f32 0.5, %v13_v1  ;;  %v18_v6 = vmul.f32 0.5, %v14_v2 }
   0x3   :  { %v19_v7 = vmul.f32 0.5, %v15_v3 }
   0x4   :  { %7 = vsyncpa [#allocation3], 0  ;;  %v25_v8 = vsel %vm24_vm0, %v16_v4, -inf  ;;  %v26_v9 = vsel %vm24_vm0, %v17_v5, -inf  ;;  %v27_v10 = vsel %vm24_vm0, %v18_v6, -inf  ;;  %v20_v20 = vld [vmem:[%s224_s1] sm:$0xff] }
   0x5   :  { %v28_v11 = vsel %vm24_vm0, %v19_v7, -inf  ;;  %v29_v12 = vmax.f32 %v25_v8, %v26_v9  ;;  %v21_v21 = vld [vmem:[%s224_s1 + $0x8] sm:$0xff]  ;;  %v22_v27 = vld [vmem:[%s224_s1 + $0x10] sm:$0xff]  ;;  %v80_v28 = vmul.f32 %v20_v20, %v16_v4  ;;  %v66_v34 = vsel %vm24_vm0, %v20_v20, 0.0  ;;  %v23_v39 = vld [vmem:[%s224_s1 + $0x18] sm:$0xff]  ;;  %s156_s1 = smov [#allocation2]  }
   0x6   :  { %v30_v13 = vmax.f32 %v27_v10, %v28_v11  ;;  %v81_v29 = vmul.f32 %v21_v21, %v17_v5  ;;  %v67_v35 = vsel %vm24_vm0, %v21_v21, 0.0  ;;  %v82_v36 = vmul.f32 %v22_v27, %v18_v6  ;;  %s108_s24 = sshll.u32 %s156_s1, 4  ;;  %s110_s27 = sshll.u32 %s225_s2, 4  ;;  %s109_s24 = int_to_ptr.vmem [resolvable:$true] %s108_s24  ;;  %s111_s27 = int_to_ptr.hbm [resolvable:$true] %s110_s27 }
   0x7   :  { %v84_v37 = vsel %vm24_vm0, %v80_v28, 0.0  ;;  %v68_v40 = vadd.f32 %v67_v35, %v66_v34  ;;  %v69_v41 = vsel %vm24_vm0, %v22_v27, 0.0  ;;  %v83_v43 = vmul.f32 %v23_v39, %v19_v7 }
   0x8   :  { %v31_v14 = vmax.f32 %v29_v12, %v30_v13  ;;  %v85_v38 = vsel %vm24_vm0, %v81_v29, 0.0  ;;  %v87_v44 = vsel %vm24_vm0, %v82_v36, 0.0  ;;  %v71_v49 = vsel %vm24_vm0, %v23_v39, 0.0 }
   0x9   :  { %v86_v42 = vadd.f32 %v85_v38, %v84_v37  ;;  %v70_v46 = vadd.f32 %v69_v41, %v68_v40  ;;  %v89_v56 = vsel %vm24_vm0, %v83_v43, 0.0  ;;  %v98_v13 = vlaneseq }
   0xa   :  { %v32_v15 = vrot.slane %v31_v14, 4 }
   0xb   :  { %v88_v52 = vadd.f32 %v87_v44, %v86_v42  ;;  %v72_v58 = vadd.f32 %v71_v49, %v70_v46 }
   0xc   :  { %v33_v16 = vmax.f32 %v31_v14, %v32_v15 }
   0xd   :  { %v90_v60 = vadd.f32 %v89_v56, %v88_v52  ;;  %v73_v62 = vrot.slane %v72_v58, 4 }
   0xe   :  { %v34_v17 = vrot.slane %v33_v16, 2 }
   0xf   :  { %v91_v0 = vrot.slane %v90_v60, 4  ;;  %v74_v2 = vadd.f32 %v73_v62, %v72_v58 }
  0x10   :  { %v35_v18 = vmax.f32 %v33_v16, %v34_v17 }
  0x12   :  { %v36_v19 = vrot.slane %v35_v18, 1 }
  0x14   :  { %v194_v22 = vmax.f32 %v35_v18, %v36_v19  ;;  %v99_v18 = vshrl.u32 %v98_v13, 7 }
  0x16   :  { %v38_v23 = vsub.f32 %v16_v4, %v194_v22  ;;  %v39_v24 = vsub.f32 %v17_v5, %v194_v22  ;;  %v40_v25 = vsub.f32 %v18_v6, %v194_v22  ;;  %v41_v26 = vsub.f32 %v19_v7, %v194_v22 }
  0x17   :  { %v92_v4 = vadd.f32 %v91_v0, %v90_v60  ;;  %v75_v6 = vrot.slane %v74_v2, 2  ;;  %vm100_vm1 = vcmp.eq.s32.totalorder %v99_v18, 0 }
  0x18   :  { %v42_v30 = vmul.f32 1.442695, %v38_v23  ;;  %v44_v31 = vmul.f32 1.442695, %v39_v24  ;;  %v46_v32 = vmul.f32 1.442695, %v40_v25 }
  0x19   :  { %v48_v33 = vmul.f32 1.442695, %v41_v26  ;;  %v93_v8 = vrot.slane %v92_v4, 2  ;;  %v76_v10 = vadd.f32 %v75_v6, %v74_v2 }
  0x1a   :  { %120 = vpow2.f32 %v42_v30 }
  0x1b   :  { %122 = vpow2.f32 %v44_v31  ;;  %v94_v11 = vadd.f32 %v93_v8, %v92_v4  ;;  %v77_v12 = vrot.slane %v76_v10, 1 }
  0x1c   :  { %124 = vpow2.f32 %v46_v32 }
  0x1d   :  { %126 = vpow2.f32 %v48_v33  ;;  %v95_v14 = vrot.slane %v94_v11, 1  ;;  %v78_v17 = vadd.f32 %v77_v12, %v76_v10 }
  0x1f   :  { %v96_v20 = vadd.f32 %v95_v14, %v94_v11 }
  0x20   :  { %v121_v45 = vpop.eup %120 }
  0x21   :  { %v123_v47 = vpop.eup %122  ;;  %v50_v48 = vsel %vm24_vm0, %v121_v45, 0.0 }
  0x22   :  { %v125_v50 = vpop.eup %124  ;;  %v51_v51 = vsel %vm24_vm0, %v123_v47, 0.0 }
  0x23   :  { %v127_v53 = vpop.eup %126  ;;  %v52_v54 = vadd.f32 %v51_v51, %v50_v48  ;;  %v53_v55 = vsel %vm24_vm0, %v125_v50, 0.0 }
  0x24   :  { %v55_v57 = vsel %vm24_vm0, %v127_v53, 0.0 }
  0x25   :  { %v54_v59 = vadd.f32 %v53_v55, %v52_v54 }
  0x27   :  { %v56_v61 = vadd.f32 %v55_v57, %v54_v59 }
  0x29   :  { %v57_v63 = vrot.slane %v56_v61, 4 }
  0x2b   :  { %v58_v1 = vadd.f32 %v57_v63, %v56_v61 }
  0x2d   :  { %v59_v3 = vrot.slane %v58_v1, 2 }
  0x2f   :  { %v60_v5 = vadd.f32 %v59_v3, %v58_v1 }
  0x31   :  { %v61_v7 = vrot.slane %v60_v5, 1 }
  0x33   :  { %v62_v9 = vadd.f32 %v61_v7, %v60_v5 }
  0x35   :  { %128 = vlog2.f32 %v62_v9 }
  0x3b   :  { %v129_v15 = vpop.eup %128 }
  0x3c   :  { %v64_v16 = vmul.f32 0.6931472, %v129_v15 }
  0x3e   :  { %v65_v19 = vadd.f32 %v64_v16, %v194_v22 }
  0x40   :  { %v79_v21 = vmul.f32 %v78_v17, %v65_v19 }
  0x42   :  { %v97_v23 = vsub.f32 %v79_v21, %v96_v20 }
  0x44   :  { %v101_v24 = vsel %vm100_vm1, %v97_v23, 0.0 }
  0x45   :  { %102 = vst.msk [vmem:[#allocation2] sm:$0xff] %vm24_vm0, %v101_v24 }
  0x46   :  { %113 = dma.vmem_to_hbm [thread:$0]  %s109_s24, 128, %s111_s27, [#allocation3]  }
  0x47   :  { %154 = dma.done.wait [#allocation3], 128  }
  0x48   :  { %155 = vsyncadd [#allocation3], 4294967168 }
  0x49   :  { %118 = vsyncpa [#allocation3], 1 }

</bundles_post_ra>
